<compile_context>
chip_gen: v6e
topology: v6e:2x2x1
jax: 0.10.0
libtpu: 0.0.40
codegen_flags: <defaults>
</compile_context>

<pallas_src>
import functools

import jax
import jax.numpy as jnp
from jax.experimental import pallas as pl
from jax.experimental.pallas import tpu as pltpu

_HIDDEN = 64


def _aggregation_kernel(x_ref, w1_ref, b1_ref, w2_ref, b2_ref, o_ref, *, precision):
    # x_ref : (tm, E)   row tile of the flattened input
    # w1_ref: (E, H)    resident across grid steps
    # b1_ref: (1, H)
    # w2_ref: (1, H)    gate weight as a row vector
    # b2_ref: (1,)      scalar in SMEM
    # o_ref : (1, tm)   lane-dense output row

    # h1: Linear(E, H) + ReLU.  MXU matmul, f32 accumulation (no input upcast).
    h = jnp.dot(x_ref[...], w1_ref[...],
                preferred_element_type=jnp.float32, precision=precision)
    h = jnp.maximum(h + b1_ref[...], 0.0)

    # gate_layer: Linear(H, 1) computed as an NT matmul so per-row gate values
    # land LANE-major:  g[0, m] = sum_k w2[0, k] * h[m, k]
    # (no relayout of h; output stores are lane-dense, unmasked for tm % 128 == 0).
    g = jax.lax.dot_general(
        w2_ref[...], h,
        dimension_numbers=(((1,), (1,)), ((), ())),
        preferred_element_type=jnp.float32,
        precision=precision,
    ) + b2_ref[0]

    o_ref[...] = jax.nn.sigmoid(g).astype(o_ref.dtype)


def _plan(n_rows, embed, hidden, in_itemsize, out_itemsize):
    """Pick the row tile `tm` and a VMEM limit sized from the actual buffers."""
    try:
        device_vmem = int(pltpu.get_tpu_info().vmem_capacity_bytes)
    except Exception:
        device_vmem = 64 << 20                 # conservative: v7x per-TC VMEM
    budget = (device_vmem * 3) // 4            # headroom for compiler scratch

    # Single-buffer the resident weights only when W1 is big enough for the
    # VMEM saving to matter (long E on v7x); constant index map => never refetched.
    weights_single = embed * hidden * 4 >= (2 << 20)

    def vmem_needed(t):
        w_mult = 1 if weights_single else 2
        weights = w_mult * (embed * hidden * 4 + 2 * hidden * 4 + 128)
        return (2 * t * embed * in_itemsize    # x tile, double-buffered
                + 2 * t * out_itemsize         # (1, tm) output, double-buffered
                + 2 * t * hidden * 4           # f32 h / gate intermediates
                + weights)

    # Memory-derived cap: ~4 MiB x tile per buffer (amortizes ~0.35 us/step
    # even at v7x's 3.2 TB/s HBM); f32 h intermediate bounded to ~4 MiB.
    tm_cap = min((4 << 20) // max(embed * in_itemsize, 1),
                 (4 << 20) // (hidden * 4))
    tm_cap = max((tm_cap // 128) * 128, 128)   # 128 = output-lane granularity

    if n_rows <= tm_cap:
        if n_rows <= 256:
            tm = n_rows                        # single full-extent block (always legal)
        else:
            # >= 2 grid steps so the "parallel" axis can use both v7x TensorCores.
            tm = ((-(-n_rows // 2) + 127) // 128) * 128
    else:
        tm = tm_cap

    # Shrink (128-row floor) if the explicit buffers would not fit the budget.
    while tm > 128 and vmem_needed(tm) > budget:
        tm = max(((tm // 2) // 128) * 128, 128)
    # TODO(synk): for E so large that even tm=128 exceeds v7x's 64 MiB VMEM
    # (f32 E >~ 40K), fall back to a sublane-major (N, 1) output so tm can
    # drop to a multiple of 8.

    vmem_limit = min(max(vmem_needed(tm) + (8 << 20), 32 << 20),
                     max(device_vmem - (2 << 20), 32 << 20))
    return tm, int(vmem_limit), weights_single


def aggregation_forward(seqs, w1, b1, w2, b2, *, precision=None):
    """seqs: (B, S, E) -> (B, S, 1), matching the PyTorch `Aggregation.forward`."""
    B, S, E = seqs.shape
    H = w1.shape[1]                            # hidden size (64 in the module)
    N = B * S
    x = seqs.reshape(N, E)

    tm, vmem_limit, weights_single = _plan(N, E, H, x.dtype.itemsize,
                                           x.dtype.itemsize)
    grid = pl.cdiv(N, tm)                      # no padding: final partial block
                                               # is handled by Pallas OOB masking

    b1_2d = b1.reshape(1, H)
    w2_2d = w2.reshape(1, H)                   # (H, 1) -> row vector, same data order
    b2_1d = b2.reshape(1)

    def resident_spec(shape):
        index_map = lambda i: (0,) * len(shape)
        if weights_single and hasattr(pl, "Buffered"):
            try:  # single-buffer resident weights (reclaims VMEM on v7x, zero cost)
                return pl.BlockSpec(shape, index_map, pipeline_mode=pl.Buffered(1))
            except TypeError:
                pass
        return pl.BlockSpec(shape, index_map)

    kernel = functools.partial(_aggregation_kernel, precision=precision)

    out = pl.pallas_call(
        kernel,
        out_shape=jax.ShapeDtypeStruct((1, N), seqs.dtype),
        grid_spec=pltpu.PrefetchScalarGridSpec(
            num_scalar_prefetch=0,
            grid=(grid,),
            in_specs=[
                pl.BlockSpec((tm, E), lambda i: (i, 0)),            # x row tile
                resident_spec((E, H)),                              # W1 (resident)
                resident_spec((1, H)),                              # b1
                resident_spec((1, H)),                              # W2 row
                pl.BlockSpec(memory_space=pltpu.MemorySpace.SMEM),  # b2 scalar
            ],
            out_specs=pl.BlockSpec((1, tm), lambda i: (0, i)),      # lane-dense out
        ),
        compiler_params=pltpu.CompilerParams(
            dimension_semantics=("parallel",),
            vmem_limit_bytes=vmem_limit,
        ),
    )(x, w1, b1_2d, w2_2d, b2_1d)

    return out.reshape(B, S, 1)


def init_params(key, embedding_size):
    """Deterministic init mirroring nn.Linear default (uniform +/- 1/sqrt(fan_in))."""
    k1, k2, k3, k4 = jax.random.split(key, 4)
    lim1 = 1.0 / jnp.sqrt(jnp.float32(embedding_size))
    lim2 = 1.0 / jnp.sqrt(jnp.float32(_HIDDEN))
    w1 = jax.random.uniform(k1, (embedding_size, _HIDDEN), jnp.float32, -lim1, lim1)
    b1 = jax.random.uniform(k2, (_HIDDEN,), jnp.float32, -lim1, lim1)
    w2 = jax.random.uniform(k3, (_HIDDEN, 1), jnp.float32, -lim2, lim2)
    b2 = jax.random.uniform(k4, (1,), jnp.float32, -lim2, lim2)
    return w1, b1, w2, b2


if __name__ == "__main__":
    key = jax.random.PRNGKey(0)
    k_in, k_par = jax.random.split(key)

    batch, seq, embedding_size = 2, 8, 32
    seqs = jax.random.normal(k_in, (batch, seq, embedding_size), jnp.float32)
    w1, b1, w2, b2 = init_params(k_par, embedding_size)

    out = jax.block_until_ready(aggregation_forward(seqs, w1, b1, w2, b2))

    # Plain-JAX reference.  Both the kernel and this reference use the DEFAULT
    # TPU matmul precision (MXU truncates f32 operands to bf16), so the
    # tolerance only needs to cover accumulation-order noise and occasional
    # bf16 rounding-boundary flips of the h intermediate.
    ref = jax.nn.sigmoid(jnp.maximum(seqs @ w1 + b1, 0.0) @ w2 + b2)
    assert out.shape == (batch, seq, 1)
    assert jnp.allclose(out, ref, atol=5e-3, rtol=5e-3), \
        float(jnp.max(jnp.abs(out - ref)))

    print("KERNEL_OK")
</pallas_src>

<mosaic_0001>
module attributes {stable_mosaic.version = 11 : i64} {
  func.func @_aggregation_kernel(%arg0: i32, %arg1: memref<16x32xf32, #tpu.memory_space<vmem>>, %arg2: memref<32x64xf32, #tpu.memory_space<vmem>>, %arg3: memref<1x64xf32, #tpu.memory_space<vmem>>, %arg4: memref<1x64xf32, #tpu.memory_space<vmem>>, %arg5: memref<1xf32, #tpu.memory_space<smem>>, %arg6: memref<1x16xf32, #tpu.memory_space<vmem>>) attributes {dimension_semantics = [#tpu.dimension_semantics<parallel>], iteration_bounds = array<i64: 1>, scalar_prefetch = 0 : i64, scratch_operands = 0 : i64, tpu.core_type = #tpu.core_type<tc>, window_params = [{transform_indices = @transform_0, window_bounds = array<i64: 16, 32>}, {pipeline_mode = #tpu.pipeline_mode<synchronous>, transform_indices = @transform_1, window_bounds = array<i64: 32, 64>}, {pipeline_mode = #tpu.pipeline_mode<synchronous>, transform_indices = @transform_2, window_bounds = array<i64: 1, 64>}, {pipeline_mode = #tpu.pipeline_mode<synchronous>, transform_indices = @transform_3, window_bounds = array<i64: 1, 64>}, {transform_indices = @transform_4, window_bounds = array<i64: 1>}, {transform_indices = @transform_5, window_bounds = array<i64: 1, 16>}]} {
    %c0 = arith.constant 0 : index
    %c0_0 = arith.constant 0 : index
    %0 = vector.load %arg1[%c0, %c0_0] : memref<16x32xf32, #tpu.memory_space<vmem>>, vector<16x32xf32>
    %c0_1 = arith.constant 0 : index
    %c0_2 = arith.constant 0 : index
    %1 = vector.load %arg2[%c0_1, %c0_2] : memref<32x64xf32, #tpu.memory_space<vmem>>, vector<32x64xf32>
    %cst = arith.constant dense<0.000000e+00> : vector<16x64xf32>
    %2 = tpu.matmul %0, %1, %cst {dimension_numbers = #tpu.dot_dimension_numbers<[1], [0], [0], [1], [0, 0, 1, 1], [], []>} : vector<16x32xf32>, vector<32x64xf32>, vector<16x64xf32> -> vector<16x64xf32>
    %c0_3 = arith.constant 0 : index
    %c0_4 = arith.constant 0 : index
    %3 = vector.load %arg3[%c0_3, %c0_4] : memref<1x64xf32, #tpu.memory_space<vmem>>, vector<1x64xf32>
    %4 = vector.broadcast %3 : vector<1x64xf32> to vector<16x64xf32>
    %5 = arith.addf %2, %4 : vector<16x64xf32>
    %cst_5 = arith.constant 0.000000e+00 : f32
    %6 = vector.broadcast %cst_5 : f32 to vector<16x64xf32>
    %7 = arith.maximumf %5, %6 : vector<16x64xf32>
    %c0_6 = arith.constant 0 : index
    %c0_7 = arith.constant 0 : index
    %8 = vector.load %arg4[%c0_6, %c0_7] : memref<1x64xf32, #tpu.memory_space<vmem>>, vector<1x64xf32>
    %cst_8 = arith.constant dense<0.000000e+00> : vector<1x16xf32>
    %9 = tpu.matmul %8, %7, %cst_8 {dimension_numbers = #tpu.dot_dimension_numbers<[1], [1], [0], [0], [0, 0, 1, 0], [], []>} : vector<1x64xf32>, vector<16x64xf32>, vector<1x16xf32> -> vector<1x16xf32>
    %c0_9 = arith.constant 0 : index
    %10 = memref.load %arg5[%c0_9] : memref<1xf32, #tpu.memory_space<smem>>
    %11 = vector.broadcast %10 : f32 to vector<1x16xf32>
    %12 = arith.addf %9, %11 : vector<1x16xf32>
    %13 = arith.negf %12 : vector<1x16xf32>
    %14 = math.exp %13 : vector<1x16xf32>
    %cst_10 = arith.constant 1.000000e+00 : f32
    %15 = vector.broadcast %cst_10 : f32 to vector<1x16xf32>
    %16 = arith.addf %15, %14 : vector<1x16xf32>
    %17 = arith.divf %15, %16 : vector<1x16xf32>
    %c0_11 = arith.constant 0 : index
    %c0_12 = arith.constant 0 : index
    %18 = vector.load %arg6[%c0_11, %c0_12] : memref<1x16xf32, #tpu.memory_space<vmem>>, vector<1x16xf32>
    tpu.vector_store %arg6[%c0_11, %c0_12], %17 {strides = array<i32>} : memref<1x16xf32, #tpu.memory_space<vmem>>, vector<1x16xf32>,
    return
  }
  func.func @transform_0(%arg0: i32) -> (i32, i32) {
    %c0_i32 = arith.constant 0 : i32
    %c0_i32_0 = arith.constant 0 : i32
    return %arg0, %c0_i32 : i32, i32
  }
  func.func @transform_1(%arg0: i32) -> (i32, i32) {
    %c0_i32 = arith.constant 0 : i32
    %c0_i32_0 = arith.constant 0 : i32
    %c0_i32_1 = arith.constant 0 : i32
    return %c0_i32, %c0_i32_0 : i32, i32
  }
  func.func @transform_2(%arg0: i32) -> (i32, i32) {
    %c0_i32 = arith.constant 0 : i32
    %c0_i32_0 = arith.constant 0 : i32
    %c0_i32_1 = arith.constant 0 : i32
    return %c0_i32, %c0_i32_0 : i32, i32
  }
  func.func @transform_3(%arg0: i32) -> (i32, i32) {
    %c0_i32 = arith.constant 0 : i32
    %c0_i32_0 = arith.constant 0 : i32
    %c0_i32_1 = arith.constant 0 : i32
    return %c0_i32, %c0_i32_0 : i32, i32
  }
  func.func @transform_4(%arg0: i32) -> i32 {
    %c0_i32 = arith.constant 0 : i32
    %c0_i32_0 = arith.constant 0 : i32
    return %c0_i32 : i32
  }
  func.func @transform_5(%arg0: i32) -> (i32, i32) {
    %c0_i32 = arith.constant 0 : i32
    %c0_i32_0 = arith.constant 0 : i32
    return %c0_i32, %arg0 : i32, i32
  }
}

</mosaic_0001>

<bundles_post_ra>
// kernel: tpu_custom_call.1
= control target key start
LH: loop header
LB: loop body
LE: loop exit
PB: predicated region body
PF: predicated region fallthrough
CT: control target
= control target key end

     0   :  { %11 = vsyncpa [#allocation4], 0  ;;  %s422_s0 = inlined_call_operand.hbm [shape: f32[16,32], index: 0, kind: input, shape index: {}]   ;;  %s423_s1 = inlined_call_operand.hbm [shape: f32[32,64], index: 1, kind: input, shape index: {}]   ;;  %s424_s2 = inlined_call_operand.vmem [shape: f32[1,64], index: 2, kind: input, shape index: {}]   ;;  %s425_s3 = inlined_call_operand.vmem [shape: f32[1,64], index: 3, kind: input, shape index: {}]   ;;  %s426_s4 = inlined_call_operand.<no memory space> [shape: f32[1], index: 4, kind: input, shape index: {}]   ;;  %s427_s5 = inlined_call_operand.hbm [shape: f32[1,16], index: 5, kind: output, shape index: {}]  }
   0x1   :  { %12 = vsyncpa [#allocation7], 0 }
   0x2   :  { %13 = vsyncpa [#allocation5], 0  ;;  %s365_s18 = smov [#allocation3]  }
   0x3   :  { %s19_s19 = sshll.u32 %s365_s18, 4  ;;  %s20_s19 = int_to_ptr.vmem [resolvable:$true] %s19_s19 }
   0x4   :  { %s307_s20 = scalar_lea.vmem %s20_s19, 256  ;;  %p312_p1 = scmp.lt.s32.totalorder %s20_s19, %s20_s19 }
   0x5   :  { %p308_p0 = scmp.ne.s32.totalorder %s20_s19, %s307_s20  ;;  %p313_p2 = scmp.lt.s32.totalorder %s307_s20, %s307_s20 }
   0x7   :  { %p314_p3 = por %p313_p2, %p312_p1 }
   0x9   :  { %p315_p4 = pnand %p314_p3, %p308_p0 }
   0xb   :  { %318 = shalt.err (!%p315_p4)
}
   0xc   :  { %s366_s21 = smov 128   ;;  %s367_s22 = smov 8  }
   0xd   :  { %25 = dma.hbm_to_vmem [thread:$0]  %s422_s0, 256, %s20_s19, [#allocation4], %s366_s21, %s366_s21, %s367_s22  }
   0xe   :  { %s368_s25 = smov [#allocation6]  }
   0xf   :  { %s31_s26 = sshll.u32 %s368_s25, 4  ;;  %s32_s26 = int_to_ptr.vmem [resolvable:$true] %s31_s26 }
  0x10   :  { %s327_s27 = scalar_lea.vmem %s32_s26, 512  ;;  %p332_p6 = scmp.lt.s32.totalorder %s32_s26, %s32_s26 }
  0x11   :  { %p328_p5 = scmp.ne.s32.totalorder %s32_s26, %s327_s27  ;;  %p333_p7 = scmp.lt.s32.totalorder %s327_s27, %s327_s27 }
  0x13   :  { %p334_p8 = por %p333_p7, %p332_p6 }
  0x15   :  { %p335_p9 = pnand %p334_p8, %p328_p5 }
  0x17   :  { %338 = shalt.err (!%p335_p9)
}
  0x18   :  { %37 = dma.hbm_to_vmem [thread:$0]  %s423_s1, 512, %s32_s26, [#allocation7], %s366_s21, %s366_s21, %s367_s22  }
  0x19   :  { %359 = dma.done.wait [#allocation4], 256  }
  0x1a   :  { %360 = vsyncadd [#allocation4], 4294967040 }
  0x1b   :  { %361 = dma.done.wait [#allocation7], 512  }
  0x1c   :  { %362 = vsyncadd [#allocation7], 4294966784  ;;  %vm63_vm0 = vcmask 261120   ;;  %v55_v0 = vld [vmem:[#allocation6 + $0x18] sm:$0xff]  ;;  %v54_v1 = vld [vmem:[#allocation6 + $0x10] sm:$0xff]  ;;  %v369_v6 = vmov 0.0   ;;  %v149_v15 = vstv %s426_s4 }
  0x1d   :  { %270 = vmatprep.subr.mxu0 %v55_v0  ;;  %v50_v2 = vld [vmem:[#allocation3] sm:$0xff]  ;;  %v53_v3 = vld [vmem:[#allocation6 + $0x8] sm:$0xff]  ;;  %v52_v4 = vld [vmem:[#allocation6] sm:$0xff]  ;;  %281 = vmatprep.subr.mxu1 %v369_v6  ;;  %vm370_vm1 = vmmov 0   ;;  %vm150_vm2 = vcmask 523264   ;;  %vm236_vm3 = vcmask 122880  }
  0x1e   :  { %271 = vmatpush3.msra.mxu0 %v55_v0  ;;  %278 = vmatprep.mubr.msk.f32.mxu0 %vm63_vm0, %v50_v2  ;;  %v51_v5 = vld [vmem:[#allocation3 + $0x8] sm:$0xff]  ;;  %v254_v7 = vld [vmem:[%s424_s2] ss:$0 sm:$0xff]  ;;  %s371_s2 = smov [#allocation8]  }
  0x1f   :  { %272 = vmatprep.subr.mxu0 %v54_v1  ;;  %285 = vmatprep.mubr.msk.f32.mxu1 %vm370_vm1, %v369_v6  ;;  %v147_v14 = vld [vmem:[%s425_s3] sm:$0x1]  ;;  %s244_s9 = sshll.u32 %s371_s2, 4  ;;  %s245_s9 = int_to_ptr.vmem [resolvable:$true] %s244_s9 }
  0x20   :  { %273 = vmatpush3.msra.mxu0 %v54_v1  ;;  %s339_s3 = scalar_lea.vmem %s245_s9, 16  ;;  %s343_s10 = scalar_lea.vmem %s245_s9, 32 }
  0x21   :  { %274 = vmatprep.subr.mxu0 %v53_v3  ;;  %p340_p10 = scmp.ne.s32.totalorder %s245_s9, %s339_s3  ;;  %p344_p11 = scmp.lt.s32.totalorder %s245_s9, %s245_s9 }
  0x22   :  { %275 = vmatpush3.msra.mxu0 %v53_v3  ;;  %p345_p12 = scmp.lt.s32.totalorder %s343_s10, %s339_s3 }
  0x23   :  { %276 = vmatprep.subr.mxu0 %v52_v4 }
  0x24   :  { %277 = vmatpush3.msra.mxu0 %v52_v4  ;;  %p346_p13 = por %p345_p12, %p344_p11 }
  0x25   :  { %279 = vmatmul.mubr.msk.f32.vlgmr.msra.gmra.mxu0 %vm63_vm0, %v51_v5 }
  0x26   :  { %p347_p0 = pnand %p346_p13, %p340_p10 }
  0xe5   :  { %v280_v8 = vpop.f32.mrf.mxu0 }
  0xe6   :  { %v142_v9 = vadd.f32 %v280_v8, %v254_v7 }
  0xe7   :  { %v136_v10 = vpop.f32.mrf.mxu0 }
  0xe8   :  { %v146_v11 = vmax.f32 %v142_v9, 0.0  ;;  %v137_v12 = vadd.f32 %v254_v7, %v136_v10 }
  0xea   :  { %282 = vmatpush3.xpose.msk.msra.mxu1 %vm150_vm2, %v146_v11  ;;  %v145_v13 = vmax.f32 %v137_v12, 0.0 }
  0xeb   :  { %283 = vmatprep.subr.mxu1 %v369_v6 }
  0xee   :  { %284 = vmatpush3.xpose.msk.msra.mxu1 %vm150_vm2, %v145_v13 }
  0xf1   :  { %286 = vmatmul.mubr.msk.f32.vlgmr.msra.gmra.mxu1 %vm150_vm2, %v147_v14 }
 0x1b1   :  { %v226_v16 = vpop.f32.mrf.mxu1 }
 0x1b2   :  { %v227_v17 = vadd.f32 %v226_v16, %v149_v15 }
 0x1b3   :  { %v287_v18 = vpop.f32.mrf.mxu1 }
 0x1b4   :  { %v260_v19 = vmul.f32 -1.442695, %v227_v17 }
 0x1b6   :  { %295 = vpow2.f32 %v260_v19 }
 0x1c3   :  { %v296_v20 = vpop.eup %295 }
 0x1c4   :  { %v233_v21 = vadd.f32 1.0, %v296_v20 }
 0x1c6   :  { %297 = vrcp.f32 %v233_v21 }
 0x1d3   :  { %v298_v22 = vpop.eup %297 }
 0x1d4   :  { %237 = vst.msk [vmem:[#allocation8] sm:$0x1] %vm236_vm3, %v298_v22 }
 0x1d5   :  { %350 = shalt.err (!%p347_p0)
}
 0x1d6   :  { %247 = dma.vmem_to_hbm [thread:$0]  %s245_s9, 16, %s427_s5, [#allocation5]  }
 0x1d7   :  { %363 = dma.done.wait [#allocation5], 16  }
 0x1d8   :  { %364 = vsyncadd [#allocation5], 4294967280 }
 0x1d9   :  { %251 = vsyncpa [#allocation4], 1 }
 0x1da   :  { %252 = vsyncpa [#allocation7], 1 }
 0x1db   :  { %253 = vsyncpa [#allocation5], 1 }

</bundles_post_ra>
